<compile_context>
chip_gen: v6e
topology: v6e:2x2x1
jax: 0.10.0
libtpu: 0.0.40
codegen_flags: <defaults>
</compile_context>

<pallas_src>
import jax
import jax.numpy as jnp
from jax.experimental import pallas as pl
from jax.experimental.pallas import tpu as pltpu

_VMEM_LIMIT_BYTES = 48 * 1024 * 1024


def _add_pos_rowtiled_kernel(x_ref, pos_ref, o_ref):
    # x/pos/o: (TR, L) lane-dense blocks (batch squeezed); pure VPU add.
    o_ref[...] = (x_ref[...] + pos_ref[...]).astype(o_ref.dtype)


def _add_pos_batched_kernel(x_ref, pos_ref, o_ref):
    # x/o: (TB, R, L); pos: (R, L) broadcast over the batch sub-axis.
    o_ref[...] = (x_ref[...] + pos_ref[...][None]).astype(o_ref.dtype)


def _sublane_multiple(itemsize):
    # Packed-sublane row multiple: f32 -> 8, bf16 -> 16, int8/fp8 -> 32.
    return max(8, 32 // int(itemsize))


def _pick_lane_layout(S, D):
    """Lane-dense 2-D view (R, L) of the per-batch (S, D) slab."""
    flat = S * D
    for cand in (512, 256, 128):
        if flat % cand == 0:
            return flat // cand, cand
    # Fallback (S*D not a multiple of 128): natural layout. Last dim = full
    # extent D is always a legal block shape; the row axis gets tiled below.
    return S, D


def _pick_row_tile(R, L, itemsize, target_block_bytes, mult):
    """Row tile TR: multiple of `mult` (or full extent), preferring divisors of R."""
    target_rows = max(1, target_block_bytes // (L * itemsize))
    if target_rows >= R:
        return R
    tr = max(mult, (target_rows // mult) * mult)
    if tr >= R:
        return R
    # Bounded search downward for a divisor of R (avoids a masked tail tile).
    cand = tr
    for _ in range(64):
        if cand < mult:
            break
        if R % cand == 0:
            return cand
        cand -= mult
    return tr


def _pick_batch_tile(B, slab_bytes, target_block_bytes):
    """Number of whole batches per block (batched mode), preferring divisors of B."""
    tb = max(1, target_block_bytes // max(slab_bytes, 1))
    tb = min(tb, B)
    cand = tb
    for _ in range(64):
        if cand <= 1:
            return 1
        if B % cand == 0:
            return cand
        cand -= 1
    return tb


def add_learned_positional_embedding(x, pos_table, *,
                                     target_block_bytes=4 * 1024 * 1024):
    """x: (B, S, D); pos_table: (max_len, D). Returns x + pos_table[:S] (broadcast over batch)."""
    B, S, D = x.shape
    max_len, Dt = pos_table.shape
    assert Dt == D, "d_model mismatch between x and embedding table"
    assert S <= max_len, "sequence length exceeds max_len"

    out_dtype = jnp.promote_types(x.dtype, pos_table.dtype)

    # Embedding lookup for positions arange(S) == contiguous row slice.
    pos = pos_table[:S].astype(out_dtype)

    itemsize = jnp.dtype(out_dtype).itemsize
    mult = _sublane_multiple(itemsize)

    R, L = _pick_lane_layout(S, D)
    x2 = x.reshape(B, R, L)
    pos2 = pos.reshape(R, L)

    slab_bytes = R * L * itemsize

    # Alias x to the output when no dtype promotion is required (drops the
    # separate output allocation; HBM traffic is unchanged).
    io_aliases = {0: 0} if x.dtype == out_dtype else {}

    if slab_bytes < target_block_bytes and B > 1:
        # ---- Batched mode: TB whole batches per block, pos broadcast in-kernel.
        TB = _pick_batch_tile(B, slab_bytes, target_block_bytes)
        grid = (pl.cdiv(B, TB),)
        out2 = pl.pallas_call(
            _add_pos_batched_kernel,
            out_shape=jax.ShapeDtypeStruct((B, R, L), out_dtype),
            grid=grid,
            in_specs=[
                pl.BlockSpec((TB, R, L), lambda b: (b, 0, 0)),
                pl.BlockSpec((R, L), lambda b: (0, 0)),
            ],
            out_specs=pl.BlockSpec((TB, R, L), lambda b: (b, 0, 0)),
            input_output_aliases=io_aliases,
            compiler_params=pltpu.CompilerParams(
                dimension_semantics=("parallel",),
                vmem_limit_bytes=_VMEM_LIMIT_BYTES,
            ),
        )(x2, pos2)
    else:
        # ---- Row-tiled mode: grid (num_r, B), batch squeezed, batch innermost
        # so the pos tile is revisited and its re-fetch elided.
        TR = _pick_row_tile(R, L, itemsize, target_block_bytes, mult)
        num_r = pl.cdiv(R, TR)
        grid = (num_r, B)
        out2 = pl.pallas_call(
            _add_pos_rowtiled_kernel,
            out_shape=jax.ShapeDtypeStruct((B, R, L), out_dtype),
            grid=grid,
            in_specs=[
                pl.BlockSpec((None, TR, L), lambda r, b: (b, r, 0)),
                pl.BlockSpec((TR, L), lambda r, b: (r, 0)),
            ],
            out_specs=pl.BlockSpec((None, TR, L), lambda r, b: (b, r, 0)),
            input_output_aliases=io_aliases,
            compiler_params=pltpu.CompilerParams(
                dimension_semantics=("parallel", "parallel"),
                vmem_limit_bytes=_VMEM_LIMIT_BYTES,
            ),
        )(x2, pos2)

    return out2.reshape(B, S, D)


if __name__ == "__main__":
    key = jax.random.PRNGKey(0)
    keys = jax.random.split(key, 8)

    # --- Config 1: small shapes consistent with the module's forward
    # (exercises the batched mode: tiny per-batch slab, >1 batch per block).
    B, S, D, MAX_LEN = 2, 8, 32, 16
    x = jax.random.normal(keys[0], (B, S, D), dtype=jnp.float32)
    pos_table = jax.random.normal(keys[1], (MAX_LEN, D), dtype=jnp.float32)
    out = jax.block_until_ready(add_learned_positional_embedding(x, pos_table))
    ref = x + pos_table[:S][None, :, :]
    assert out.shape == (B, S, D)
    assert jnp.allclose(out, ref, atol=1e-6), "mismatch vs reference (config 1)"

    # --- Config 2: exercise the row-tiled mode (tiny target -> multiple row tiles).
    B2, S2, D2, MAX_LEN2 = 2, 64, 128, 128
    x2_in = jax.random.normal(keys[2], (B2, S2, D2), dtype=jnp.float32)
    pos_table2 = jax.random.normal(keys[3], (MAX_LEN2, D2), dtype=jnp.float32)
    out2 = jax.block_until_ready(
        add_learned_positional_embedding(x2_in, pos_table2,
                                         target_block_bytes=16 * 1024))
    ref2 = x2_in + pos_table2[:S2][None, :, :]
    assert out2.shape == (B2, S2, D2)
    assert jnp.allclose(out2, ref2, atol=1e-6), "mismatch vs reference (config 2)"

    # --- Config 3: odd-D fallback path (S*D % 128 != 0), tiled sublane axis.
    B3, S3, D3, MAX_LEN3 = 2, 16, 36, 32
    x3_in = jax.random.normal(keys[4], (B3, S3, D3), dtype=jnp.float32)
    pos_table3 = jax.random.normal(keys[5], (MAX_LEN3, D3), dtype=jnp.float32)
    out3 = jax.block_until_ready(
        add_learned_positional_embedding(x3_in, pos_table3,
                                         target_block_bytes=1024))
    ref3 = x3_in + pos_table3[:S3][None, :, :]
    assert out3.shape == (B3, S3, D3)
    assert jnp.allclose(out3, ref3, atol=1e-6), "mismatch vs reference (config 3)"

    # --- Config 4: bf16 inputs (packed-sublane row multiple, batched mode).
    B4, S4, D4, MAX_LEN4 = 4, 8, 128, 16
    x4_in = jax.random.normal(keys[6], (B4, S4, D4), dtype=jnp.bfloat16)
    pos_table4 = jax.random.normal(keys[7], (MAX_LEN4, D4), dtype=jnp.bfloat16)
    out4 = jax.block_until_ready(add_learned_positional_embedding(x4_in, pos_table4))
    ref4 = x4_in + pos_table4[:S4][None, :, :]
    assert out4.shape == (B4, S4, D4)
    assert jnp.allclose(out4.astype(jnp.float32), ref4.astype(jnp.float32),
                        atol=1e-2), "mismatch vs reference (config 4)"

    print("KERNEL_OK")
</pallas_src>

<mosaic_0001>
module attributes {stable_mosaic.version = 11 : i64} {
  func.func @_add_pos_batched_kernel(%arg0: i32, %arg1: memref<2x1x256xf32, #tpu.memory_space<vmem>>, %arg2: memref<1x256xf32, #tpu.memory_space<vmem>>, %arg3: memref<2x1x256xf32, #tpu.memory_space<vmem>>) attributes {dimension_semantics = [#tpu.dimension_semantics<parallel>], iteration_bounds = array<i64: 1>, scalar_prefetch = 0 : i64, scratch_operands = 0 : i64, tpu.core_type = #tpu.core_type<tc>, window_params = [{transform_indices = @transform_0, window_bounds = array<i64: 2, 1, 256>}, {pipeline_mode = #tpu.pipeline_mode<synchronous>, transform_indices = @transform_1, window_bounds = array<i64: 1, 256>}, {transform_indices = @transform_2, window_bounds = array<i64: 2, 1, 256>}]} {
    %c0 = arith.constant 0 : index
    %c0_0 = arith.constant 0 : index
    %c0_1 = arith.constant 0 : index
    %0 = vector.load %arg1[%c0, %c0_0, %c0_1] : memref<2x1x256xf32, #tpu.memory_space<vmem>>, vector<2x1x256xf32>
    %c0_2 = arith.constant 0 : index
    %c0_3 = arith.constant 0 : index
    %1 = vector.load %arg2[%c0_2, %c0_3] : memref<1x256xf32, #tpu.memory_space<vmem>>, vector<1x256xf32>
    %2 = vector.shape_cast %1 : vector<1x256xf32> to vector<1x1x256xf32>
    %3 = vector.broadcast %2 : vector<1x1x256xf32> to vector<2x1x256xf32>
    %4 = arith.addf %0, %3 : vector<2x1x256xf32>
    %c0_4 = arith.constant 0 : index
    %c0_5 = arith.constant 0 : index
    %c0_6 = arith.constant 0 : index
    %5 = vector.load %arg3[%c0_4, %c0_5, %c0_6] : memref<2x1x256xf32, #tpu.memory_space<vmem>>, vector<2x1x256xf32>
    tpu.vector_store %arg3[%c0_4, %c0_5, %c0_6], %4 {strides = array<i32>} : memref<2x1x256xf32, #tpu.memory_space<vmem>>, vector<2x1x256xf32>,
    return
  }
  func.func @transform_0(%arg0: i32) -> (i32, i32, i32) {
    %c0_i32 = arith.constant 0 : i32
    %c0_i32_0 = arith.constant 0 : i32
    %c0_i32_1 = arith.constant 0 : i32
    return %arg0, %c0_i32, %c0_i32_0 : i32, i32, i32
  }
  func.func @transform_1(%arg0: i32) -> (i32, i32) {
    %c0_i32 = arith.constant 0 : i32
    %c0_i32_0 = arith.constant 0 : i32
    %c0_i32_1 = arith.constant 0 : i32
    return %c0_i32, %c0_i32_0 : i32, i32
  }
  func.func @transform_2(%arg0: i32) -> (i32, i32, i32) {
    %c0_i32 = arith.constant 0 : i32
    %c0_i32_0 = arith.constant 0 : i32
    %c0_i32_1 = arith.constant 0 : i32
    return %arg0, %c0_i32, %c0_i32_0 : i32, i32, i32
  }
}

</mosaic_0001>

<bundles_post_ra>
// kernel: tpu_custom_call.1
= control target key start
LH: loop header
LB: loop body
LE: loop exit
PB: predicated region body
PF: predicated region fallthrough
CT: control target
= control target key end

     0   :  { %7 = vsyncpa [#allocation3], 0  ;;  %s130_s0 = inlined_call_operand.hbm [shape: f32[2,1,256], index: 0, kind: input, shape index: {}, may-alias: {0,2}]   ;;  %s131_s1 = inlined_call_operand.vmem [shape: f32[1,256], index: 1, kind: input, shape index: {}]   ;;  %s132_s2 = inlined_call_operand.hbm [shape: f32[2,1,256], index: 2, kind: output, shape index: {}, may-alias: {0,2}]  }
   0x1   :  { %8 = vsyncpa [#allocation4], 0  ;;  %s102_s9 = smov [#allocation2]  }
   0x2   :  { %s14_s10 = sshll.u32 %s102_s9, 4  ;;  %s15_s10 = int_to_ptr.vmem [resolvable:$true] %s14_s10 }
   0x3   :  { %s66_s11 = scalar_lea.vmem %s15_s10, 64  ;;  %p71_p1 = scmp.lt.s32.totalorder %s15_s10, %s15_s10 }
   0x4   :  { %p67_p0 = scmp.ne.s32.totalorder %s15_s10, %s66_s11  ;;  %p72_p2 = scmp.lt.s32.totalorder %s66_s11, %s66_s11 }
   0x6   :  { %p73_p3 = por %p72_p2, %p71_p1 }
   0x8   :  { %p74_p4 = pnand %p73_p3, %p67_p0 }
   0xa   :  { %77 = shalt.err (!%p74_p4)
}
   0xb   :  { %s103_s12 = smov 32   ;;  %s104_s13 = smov 2  }
   0xc   :  { %20 = dma.hbm_to_vmem [thread:$0]  %s130_s0, 64, %s15_s10, [#allocation3], %s103_s12, %s103_s12, %s104_s13  }
   0xd   :  { %98 = dma.done.wait [#allocation3], 64  }
   0xe   :  { %99 = vsyncadd [#allocation3], 4294967232  ;;  %v31_v0 = vlaneseq  ;;  %s105_s16 = smov [#allocation5]   ;;  %v26_v1 = vld [vmem:[#allocation2] sm:$0x3] }
   0xf   :  { %s42_s17 = sshll.u32 %s105_s16, 4  ;;  %v28_v2 = vld [vmem:[%s131_s1] sm:$0x3]  ;;  %v27_v3 = vld [vmem:[#allocation2 + $0x2] sm:$0x3]  ;;  %s43_s17 = int_to_ptr.vmem [resolvable:$true] %s42_s17 }
  0x10   :  { %vm33_vm0 = vcmp.lt.s32.totalorder %v31_v0, 256  ;;  %v29_v4 = vadd.f32 %v28_v2, %v26_v1  ;;  %v30_v5 = vadd.f32 %v28_v2, %v27_v3  ;;  %s78_s20 = scalar_lea.vmem %s43_s17, 64  ;;  %p83_p6 = scmp.lt.s32.totalorder %s43_s17, %s43_s17 }
  0x11   :  { %p79_p5 = scmp.ne.s32.totalorder %s43_s17, %s78_s20  ;;  %p84_p7 = scmp.lt.s32.totalorder %s78_s20, %s78_s20 }
  0x12   :  { %35 = vst.msk [vmem:[#allocation5] sm:$0x3] %vm33_vm0, %v29_v4  ;;  %36 = vst.msk [vmem:[#allocation5 + $0x2] sm:$0x3] %vm33_vm0, %v30_v5 }
  0x13   :  { %p85_p8 = por %p84_p7, %p83_p6 }
  0x15   :  { %p86_p9 = pnand %p85_p8, %p79_p5 }
  0x17   :  { %89 = shalt.err (!%p86_p9)
}
  0x18   :  { %48 = dma.vmem_to_hbm [thread:$0]  %s43_s17, 64, %s132_s2, [#allocation4], %s103_s12, %s103_s12, %s104_s13  }
  0x19   :  { %100 = dma.done.wait [#allocation4], 64  }
  0x1a   :  { %101 = vsyncadd [#allocation4], 4294967232 }
  0x1b   :  { %52 = vsyncpa [#allocation3], 1 }
  0x1c   :  { %53 = vsyncpa [#allocation4], 1 }

</bundles_post_ra>
